<compile_context>
chip_gen: v7x
topology: tpu7x:2x2x1
jax: 0.10.0
libtpu: 0.0.40
codegen_flags: <defaults>
</compile_context>

<pallas_src>
import functools

import jax
import jax.numpy as jnp
from jax.experimental import pallas as pl
from jax.experimental.pallas import tpu as pltpu


def _round_up(x, m):
    return ((x + m - 1) // m) * m


def _sublane_align(dtype):
    itemsize = jnp.dtype(dtype).itemsize
    return {4: 8, 2: 16, 1: 32}.get(itemsize, 8)


def _choose_p(N, p_target, align):
    """Planes (rows of the (N, L) view) per grid block.

    Returns (P, ragged).  P is a multiple of `align` (or equals N); if
    `ragged` is False, P also divides N exactly (no padded tail, no pad copy).
    """
    p_target = max(1, min(p_target, N))
    if N <= align:
        return N, False                       # single block == full first dim
    # Largest multiple of `align` that divides N and is <= p_target.
    p = (p_target // align) * align
    tries = 0
    while p >= align and tries < 4096:
        if N % p == 0:
            return p, False
        p -= align
        tries += 1
    # No suitable divisor: ragged last block, masked inside the kernel.
    return max(align, (p_target // align) * align), True


def _tv_block_kernel(hmask_ref, x_ref, o_ref, *, W, H, N, P, ragged):
    """One grid step: P whole planes, each flattened to one row of L = H*W.

    hmask_ref: (1, L-1) f32; 1.0 where flat columns j and j+1 are horizontal
               neighbours in the same image row (j % W != W-1), else 0.0.
    x_ref:     (P, L) input dtype.
    o_ref:     (8, 128) f32 private output slab; partial sum stored at [0, 0].
    """
    x = x_ref[...].astype(jnp.float32)        # cast once right after load
    L = x.shape[1]

    if ragged:
        # Last block may extend past the N real planes: zero the garbage rows
        # (select, so NaN garbage cannot leak into the sum).
        base = pl.program_id(0) * P
        row = jax.lax.broadcasted_iota(jnp.int32, x.shape, 0)
        x = jnp.where(row + base < N, x, jnp.float32(0.0))

    s = jnp.float32(0.0)
    if L >= 2:
        # Horizontal: |x[., j+1] - x[., j]|, masked at image-row seams.
        dh = jnp.abs(x[:, 1:] - x[:, :-1]) * hmask_ref[...]
        s = s + jnp.sum(dh)
    if H >= 2:
        # Vertical: |x[., j+W] - x[., j]|; every such pair is valid -> no mask.
        dv = jnp.abs(x[:, W:] - x[:, : L - W])
        s = s + jnp.sum(dv)

    # Single unmasked full-block store: partial sum at [0, 0], zeros elsewhere.
    r8 = jax.lax.broadcasted_iota(jnp.int32, (8, 128), 0)
    c8 = jax.lax.broadcasted_iota(jnp.int32, (8, 128), 1)
    o_ref[...] = jnp.where((r8 == 0) & (c8 == 0), s, jnp.float32(0.0))


def total_variation_loss(x, *, target_block_bytes=2 * 1024 * 1024):
    """x: (B, C, H, W) array -> scalar float32 TV loss (abs-diff sums / B)."""
    B, C, H, W = x.shape
    N = B * C
    L = H * W
    if N == 0 or L < 2:
        return jnp.float32(0.0)

    itemsize = jnp.dtype(x.dtype).itemsize
    align = _sublane_align(x.dtype)

    # Block sizing from the lane-padded f32 footprint (f32 temporaries
    # dominate VMEM; lane-dense rows mean L, not W, is what gets padded).
    Lpad = _round_up(L, 128)
    row_bytes = Lpad * 4
    p_target = max(1, target_block_bytes // row_bytes)
    P, ragged = _choose_p(N, p_target, align)

    # v7x megacore: give the "parallel" grid at least two blocks when N allows.
    num_blocks = -(-N // P)
    if num_blocks < 2 and N > align:
        P2, ragged2 = _choose_p(N, max(align, N // 2), align)
        if -(-N // P2) >= 2:
            P, ragged = P2, ragged2
            num_blocks = -(-N // P)

    # TODO(synk): for single planes whose padded block exceeds the VMEM budget,
    # also tile the flattened L axis (with seam handling) instead of loading
    # `align` whole planes per block.

    x2d = x.reshape(N, L)                     # free row-major view, no copy
    col = jnp.arange(L - 1, dtype=jnp.int32)
    hmask = (col % W != W - 1).astype(jnp.float32).reshape(1, L - 1)

    kernel = functools.partial(_tv_block_kernel, W=W, H=H, N=N, P=P, ragged=ragged)

    in_block_bytes = P * Lpad * itemsize
    f32_block_bytes = P * Lpad * 4
    vmem_needed = 2 * in_block_bytes + 6 * f32_block_bytes + (2 << 20)
    vmem_limit = int(min(max(32 << 20, vmem_needed), 100 << 20))

    out = pl.pallas_call(
        kernel,
        out_shape=jax.ShapeDtypeStruct((num_blocks * 8, 128), jnp.float32),
        grid_spec=pltpu.PrefetchScalarGridSpec(
            num_scalar_prefetch=0,
            grid=(num_blocks,),
            in_specs=[
                pl.BlockSpec((1, L - 1), lambda i: (0, 0)),   # seam mask (constant block)
                pl.BlockSpec((P, L), lambda i: (i, 0)),       # P planes per step
            ],
            out_specs=pl.BlockSpec((8, 128), lambda i: (i, 0)),
        ),
        compiler_params=pltpu.CompilerParams(
            dimension_semantics=("parallel",),
            vmem_limit_bytes=vmem_limit,
        ),
        cost_estimate=pl.CostEstimate(
            flops=6 * N * L,
            transcendentals=0,
            bytes_accessed=N * L * itemsize + (L - 1) * 4 + num_blocks * 8 * 128 * 4,
        ),
    )(hmask, x2d)

    # Final cross-block reduce + normalization (cheap, plain JAX).
    return jnp.sum(out) / jnp.float32(B)


def total_variation_loss_ref(x):
    xf = x.astype(jnp.float32)
    horizontal = jnp.sum(jnp.abs(xf[:, :, :, 1:] - xf[:, :, :, :-1]))
    vertical = jnp.sum(jnp.abs(xf[:, :, 1:, :] - xf[:, :, :-1, :]))
    return (horizontal + vertical) / x.shape[0]


if __name__ == "__main__":
    key = jax.random.PRNGKey(0)

    # Primary test: shape implied by the module (batch=2, channels=4, 16x16).
    B, C, H, W = 2, 4, 16, 16
    x = jax.random.normal(key, (B, C, H, W), dtype=jnp.float32)
    out = jax.jit(total_variation_loss)(x)
    out = jax.block_until_ready(out)
    ref = total_variation_loss_ref(x)
    assert jnp.allclose(out, ref, rtol=1e-4, atol=1e-4), (out, ref)

    # Secondary test: more planes -> multi-block "parallel" grid path.
    x2 = jax.random.normal(key, (4, 4, 16, 16), dtype=jnp.float32)
    out2 = jax.block_until_ready(jax.jit(total_variation_loss)(x2))
    ref2 = total_variation_loss_ref(x2)
    assert jnp.allclose(out2, ref2, rtol=1e-4, atol=1e-4), (out2, ref2)

    print("KERNEL_OK")
</pallas_src>

<mosaic_0001>
module attributes {stable_mosaic.version = 11 : i64} {
  func.func @_tv_block_kernel(%arg0: i32, %arg1: memref<1x255xf32, #tpu.memory_space<vmem>>, %arg2: memref<8x256xf32, #tpu.memory_space<vmem>>, %arg3: memref<8x128xf32, #tpu.memory_space<vmem>>) attributes {dimension_semantics = [#tpu.dimension_semantics<parallel>], iteration_bounds = array<i64: 1>, scalar_prefetch = 0 : i64, scratch_operands = 0 : i64, tpu.core_type = #tpu.core_type<tc>, window_params = [{pipeline_mode = #tpu.pipeline_mode<synchronous>, transform_indices = @transform_0, window_bounds = array<i64: 1, 255>}, {transform_indices = @transform_1, window_bounds = array<i64: 8, 256>}, {transform_indices = @transform_2, window_bounds = array<i64: 8, 128>}]} {
    %c0 = arith.constant 0 : index
    %c0_0 = arith.constant 0 : index
    %0 = vector.load %arg2[%c0, %c0_0] : memref<8x256xf32, #tpu.memory_space<vmem>>, vector<8x256xf32>
    %1 = vector.extract_strided_slice %0 {offsets = [0, 1], sizes = [8, 255], strides = [1, 1]} : vector<8x256xf32> to vector<8x255xf32>
    %2 = vector.extract_strided_slice %0 {offsets = [0, 0], sizes = [8, 255], strides = [1, 1]} : vector<8x256xf32> to vector<8x255xf32>
    %3 = arith.subf %1, %2 : vector<8x255xf32>
    %4 = math.absf %3 : vector<8x255xf32>
    %c0_1 = arith.constant 0 : index
    %c0_2 = arith.constant 0 : index
    %5 = vector.load %arg1[%c0_1, %c0_2] : memref<1x255xf32, #tpu.memory_space<vmem>>, vector<1x255xf32>
    %6 = vector.broadcast %5 : vector<1x255xf32> to vector<8x255xf32>
    %7 = arith.mulf %4, %6 : vector<8x255xf32>
    %8 = vector.shape_cast %7 : vector<8x255xf32> to vector<1x8x255xf32>
    %cst = arith.constant dense<0.000000e+00> : vector<1xf32>
    %9 = vector.multi_reduction <add>, %8, %cst [1, 2] : vector<1x8x255xf32> to vector<1xf32>
    %10 = vector.shape_cast %9 : vector<1xf32> to vector<1x1x1xf32>
    %11 = vector.extract %10[0, 0, 0] : f32 from vector<1x1x1xf32>
    %cst_3 = arith.constant 0.000000e+00 : f32
    %12 = arith.addf %cst_3, %11 : f32
    %13 = vector.extract_strided_slice %0 {offsets = [0, 16], sizes = [8, 240], strides = [1, 1]} : vector<8x256xf32> to vector<8x240xf32>
    %14 = vector.extract_strided_slice %0 {offsets = [0, 0], sizes = [8, 240], strides = [1, 1]} : vector<8x256xf32> to vector<8x240xf32>
    %15 = arith.subf %13, %14 : vector<8x240xf32>
    %16 = math.absf %15 : vector<8x240xf32>
    %17 = vector.shape_cast %16 : vector<8x240xf32> to vector<1x8x240xf32>
    %cst_4 = arith.constant dense<0.000000e+00> : vector<1xf32>
    %18 = vector.multi_reduction <add>, %17, %cst_4 [1, 2] : vector<1x8x240xf32> to vector<1xf32>
    %19 = vector.shape_cast %18 : vector<1xf32> to vector<1x1x1xf32>
    %20 = vector.extract %19[0, 0, 0] : f32 from vector<1x1x1xf32>
    %21 = arith.addf %12, %20 : f32
    %22 = tpu.iota {dimensions = array<i32: 0>} : vector<8x128xi32>
    %23 = tpu.iota {dimensions = array<i32: 1>} : vector<8x128xi32>
    %c0_i32 = arith.constant 0 : i32
    %24 = vector.broadcast %c0_i32 : i32 to vector<8x128xi32>
    %25 = arith.cmpi eq, %22, %24 : vector<8x128xi32>
    %c0_i32_5 = arith.constant 0 : i32
    %26 = vector.broadcast %c0_i32_5 : i32 to vector<8x128xi32>
    %27 = arith.cmpi eq, %23, %26 : vector<8x128xi32>
    %28 = arith.andi %25, %27 : vector<8x128xi1>
    %cst_6 = arith.constant 0.000000e+00 : f32
    %29 = vector.broadcast %21 : f32 to vector<8x128xf32>
    %30 = vector.broadcast %cst_6 : f32 to vector<8x128xf32>
    %31 = arith.select %28, %29, %30 : vector<8x128xi1>, vector<8x128xf32>
    %c0_7 = arith.constant 0 : index
    %c0_8 = arith.constant 0 : index
    %32 = vector.load %arg3[%c0_7, %c0_8] : memref<8x128xf32, #tpu.memory_space<vmem>>, vector<8x128xf32>
    tpu.vector_store %arg3[%c0_7, %c0_8], %31 {strides = array<i32>} : memref<8x128xf32, #tpu.memory_space<vmem>>, vector<8x128xf32>,
    return
  }
  func.func @transform_0(%arg0: i32) -> (i32, i32) {
    %c0_i32 = arith.constant 0 : i32
    %c0_i32_0 = arith.constant 0 : i32
    %c0_i32_1 = arith.constant 0 : i32
    return %c0_i32, %c0_i32_0 : i32, i32
  }
  func.func @transform_1(%arg0: i32) -> (i32, i32) {
    %c0_i32 = arith.constant 0 : i32
    %c0_i32_0 = arith.constant 0 : i32
    return %arg0, %c0_i32 : i32, i32
  }
  func.func @transform_2(%arg0: i32) -> (i32, i32) {
    %c0_i32 = arith.constant 0 : i32
    %c0_i32_0 = arith.constant 0 : i32
    return %arg0, %c0_i32 : i32, i32
  }
}

</mosaic_0001>

<bundles_post_ra>
// kernel: total_variation_loss.1
= control target key start
LH: loop header
LB: loop body
LE: loop exit
PB: predicated region body
PF: predicated region fallthrough
CT: control target
= control target key end

     0   :  { %v29_v0 = vlaneseq  ;;  %s124_s11 = smov 16   ;;  %s125_s12 = smov 1   ;;  %vm19_vm0 = vcmask 7168   ;;  %vm72_vm1 = vcmask 130048   ;;  %vm52_vm2 = vcmask 1039360   ;;  %s162_s1 = inlined_call_operand.vmem [shape: f32[8,256], index: 1, kind: input, shape index: {}]   ;;  %s163_s0 = inlined_call_operand.vmem [shape: f32[1,255], index: 0, kind: input, shape index: {}]   ;;  %s164_s2 = inlined_call_operand.vmem [shape: f32[8,128], index: 2, kind: output, shape index: {}]  }
   0x1   :  { %v11_v1 = vld [vmem:[%s162_s1] sm:$0xff]  ;;  %v12_v3 = vld [vmem:[%s162_s1 + $0x8] sm:$0xff]  ;;  %s127_s1 = smov 112   ;;  %vm86_vm3 = vcmask 916480  }
   0x2   :  { %68 = vrot.lane.b32.xlu1 %v11_v1, %s124_s11  ;;  %15 = vrot.lane.b32.xlu0 %v11_v1, %s125_s12  ;;  %v147_v2 = vshrl.u32 %v29_v0, 7  ;;  %v27_v4 = vld [vmem:[%s163_s0] sm:$0x3]  ;;  %s126_s0 = smov 127   ;;  %v105_v52 = vand.u32 127, %v29_v0 }
   0x4   :  { %v35_v5 = vsub.s32 1, %v147_v2  ;;  %v31_v6 = vsub.s32 0, %v147_v2  ;;  %vm106_vm4 = vcmp.eq.s32.totalorder %v147_v2, 0  ;;  %vm107_vm5 = vcmp.eq.s32.totalorder %v105_v52, 0 }
   0x5   :  { %vm108_vm6 = vmand %vm106_vm4, %vm107_vm5 }
   0x6   :  { %70 = vrot.lane.b32.xlu1 %v12_v3, %s124_s11  ;;  %17 = vrot.lane.b32.xlu0 %v12_v3, %s125_s12  ;;  %v36_v7 = vrot.slane %v27_v4, %v35_v5  ;;  %v32_v8 = vrot.slane %v27_v4, %v31_v6 }
   0xa   :  { %39 = vrot.lane.b32.xlu1 %v36_v7, %s125_s12  ;;  %37 = vrot.lane.b32.xlu0 %v32_v8, %s125_s12 }
  0x74   :  { %v69_v9 = vpop.permute.xlu1 %68  ;;  %v16_v10 = vpop.permute.xlu0 %15 }
  0x75   :  { %v23_v11 = vsub.f32 %v11_v1, %v16_v10  ;;  %v76_v21 = vsub.f32 %v11_v1, %v69_v9 }
  0x77   :  { %v25_v16 = vand.u32 2147483647, %v23_v11  ;;  %v78_v26 = vand.u32 2147483647, %v76_v21 }
  0x78   :  { %v71_v12 = vpop.permute.xlu1 %70  ;;  %v18_v13 = vpop.permute.xlu0 %17 }
  0x79   :  { %v20_v14 = vsel %vm19_vm0, %v16_v10, %v18_v13  ;;  %v73_v17 = vsel %vm72_vm1, %v69_v9, %v71_v12 }
  0x7a   :  { %v24_v15 = vsub.f32 %v12_v3, %v20_v14  ;;  %v77_v24 = vsub.f32 %v12_v3, %v73_v17 }
  0x7c   :  { %v26_v18 = vand.u32 2147483647, %v24_v15  ;;  %v40_v19 = vpop.permute.xlu1 %39  ;;  %v38_v20 = vpop.permute.xlu0 %37  ;;  %v79_v27 = vand.u32 2147483647, %v77_v24 }
  0x7d   :  { %v41_v22 = vsel %vm19_vm0, %v38_v20, %v40_v19  ;;  %v44_v23 = vmul.f32 %v38_v20, %v25_v16 }
  0x7e   :  { %v45_v25 = vmul.f32 %v41_v22, %v26_v18 }
  0x7f   :  { %48 = vrot.lane.b32.xlu0 %v44_v23, %s126_s0 }
  0x80   :  { %50 = vrot.lane.b32.xlu1 %v45_v25, %s126_s0 }
  0x83   :  { %82 = vrot.lane.b32.xlu0 %v78_v26, %s127_s1 }
  0x84   :  { %84 = vrot.lane.b32.xlu1 %v79_v27, %s127_s1 }
  0xf1   :  { %v49_v28 = vpop.permute.xlu0 %48 }
  0xf2   :  { %v51_v29 = vpop.permute.xlu1 %50 }
  0xf3   :  { %v53_v30 = vsel %vm52_vm2, %v49_v28, %v51_v29  ;;  %v56_v31 = vsel %vm52_vm2, %v51_v29, 0.0 }
  0xf4   :  { %v57_v32 = vadd.f32 %v56_v31, %v53_v30 }
  0xf5   :  { %v83_v33 = vpop.permute.xlu0 %82 }
  0xf6   :  { %58 = vadd.xlane.f32.xlu0 %v57_v32  ;;  %v85_v34 = vpop.permute.xlu1 %84 }
  0xf7   :  { %v87_v35 = vsel %vm86_vm3, %v83_v33, %v85_v34  ;;  %v90_v36 = vsel %vm86_vm3, %v85_v34, 0.0 }
  0xf8   :  { %v91_v37 = vadd.f32 %v90_v36, %v87_v35 }
  0xfa   :  { %92 = vadd.xlane.f32.xlu1 %v91_v37 }
 0x183   :  { %v59_v38 = vpop.xlane.xlu0 %58 }
 0x184   :  { %v60_v39 = vrot.slane %v59_v38, 4 }
 0x186   :  { %v61_v40 = vadd.f32 %v60_v39, %v59_v38 }
 0x187   :  { %v93_v41 = vpop.xlane.xlu1 %92 }
 0x188   :  { %v62_v42 = vrot.slane %v61_v40, 2  ;;  %v94_v43 = vrot.slane %v93_v41, 4 }
 0x18a   :  { %v95_v44 = vadd.f32 %v94_v43, %v93_v41  ;;  %v63_v45 = vadd.f32 %v62_v42, %v61_v40 }
 0x18c   :  { %v96_v46 = vrot.slane %v95_v44, 2  ;;  %v64_v47 = vrot.slane %v63_v45, 1 }
 0x18e   :  { %v97_v48 = vadd.f32 %v96_v46, %v95_v44  ;;  %v65_v49 = vadd.f32 %v64_v47, %v63_v45 }
 0x190   :  { %116 = vpush %v65_v49  ;;  %v98_v50 = vrot.slane %v97_v48, 1 }
 0x192   :  { %v99_v51 = vadd.f32 %v98_v50, %v97_v48 }
 0x194   :  { %118 = vpush %v99_v51 }
 0x1c1   :  { %s117_s17 = spop %116 }
 0x1c5   :  { %s119_s18 = spop %118 }
 0x1c6   :  { %s101_s19 = sadd.f32 %s119_s18, %s117_s17 }
 0x1c8   :  { %v109_v53 = vstv %s101_s19 }
 0x1c9   :  { %v110_v54 = vsel %vm108_vm6, %v109_v53, 0.0 }
 0x1ca   :  { %111 = vst [vmem:[%s164_s2] sm:$0xff] %v110_v54 }

</bundles_post_ra>
